<compile_context>
chip_gen: v5e
topology: v5e:2x2
jax: 0.10.0
libtpu: 0.0.40
codegen_flags: <defaults>
</compile_context>

<pallas_src>
import functools
import math

import jax
import jax.numpy as jnp
from jax import lax
from jax.experimental import pallas as pl
from jax.experimental.pallas import tpu as pltpu


_STEP_BUDGET = 16 << 20      # double-buffered (in + out) bytes per grid step
_VMEM_LIMIT = 48 << 20       # scoped VMEM limit (v5e default is only 16 MiB)
_FLAT_SEL_LIMIT = 2 << 20    # max dense bytes for the flattened-plane selector
_COL_CHUNK = 128             # input-column chunk width for the row-slab path


def _round_up(n, m):
    return ((n + m - 1) // m) * m


def _sublane(itemsize):
    # rows per packed sublane tile: 8 (f32), 16 (bf16/f16), 32 (int8/fp8)
    return max(8, 32 // max(int(itemsize), 1))


def _pick_block_rows(total_rows, bytes_per_row, itemsize, *,
                     reserved_bytes=0, budget_bytes=_STEP_BUDGET, min_steps=4):
    """Rows per grid step, sized purely by VMEM-padded bytes.

    No divisibility requirement: the grid uses cdiv and a padded last block is
    harmless for these row-independent copy kernels.  Rows are a multiple of
    the dtype's sublane packing, and >= min_steps grid steps are kept when the
    problem is big enough (v7x shards the parallel axis over 2 TensorCores)."""
    sub = _sublane(itemsize)
    if total_rows <= sub:
        return total_rows
    budget = max(budget_bytes - reserved_bytes, 2 << 20)
    cap = max(sub, (budget // max(bytes_per_row, 1)) // sub * sub)
    want = _round_up(pl.cdiv(total_rows, min_steps), sub)
    return max(sub, min(cap, want))


def _compute_dtype(x_dtype):
    # TODO(synk): integer inputs with |value| >= 2**24 lose exactness through
    # the f32 copy path (nearest should be a bitwise copy).
    return x_dtype if jnp.issubdtype(x_dtype, jnp.floating) else jnp.float32


def _src_indices(out_size, in_size, sf):
    """Nearest source index.  Integer sf >= 1: exact dst // sf.  Otherwise the
    PyTorch scale_factor rule: floor(dst * float32(1/sf)), clamped."""
    if float(sf).is_integer() and sf >= 1:
        return jnp.arange(out_size, dtype=jnp.int32) // int(sf)
    d = jnp.arange(out_size, dtype=jnp.float32)
    src = jnp.floor(d * jnp.float32(1.0 / float(sf))).astype(jnp.int32)
    return jnp.clip(src, 0, in_size - 1)


# ---------------------------------------------------------------------------
# Path 1: small planes — lane-dense (N*C, H*W) -> (N*C, Hout*Wout) copy via a
# single resident flattened one-hot selector.
# ---------------------------------------------------------------------------
def _flat_copy_kernel(x_ref, sel_ref, o_ref):
    """x_ref: (bp, H*W); sel_ref: (H*W, Hout*Wout) one-hot; o: (bp, Hout*Wout)."""
    sel = sel_ref[...]
    y = jnp.dot(x_ref[...].astype(sel.dtype), sel,
                preferred_element_type=jnp.float32)
    o_ref[...] = y.astype(o_ref.dtype)


def _flat_selector(h, w, h_out, w_out, sf_h, sf_w, dtype):
    row_src = _src_indices(h_out, h, sf_h)                     # (h_out,)
    col_src = _src_indices(w_out, w, sf_w)                     # (w_out,)
    src = (row_src[:, None] * w + col_src[None, :]).reshape(1, h_out * w_out)
    i = lax.broadcasted_iota(jnp.int32, (h * w, h_out * w_out), 0)
    return (i == src).astype(dtype)


def _interpolate_flat(x, h_out, w_out, sf_h, sf_w):
    n, c, h, w = x.shape
    p, hw, howo = n * c, h * w, h_out * w_out
    itemsize = jnp.dtype(x.dtype).itemsize
    cdt = _compute_dtype(x.dtype)
    sel = _flat_selector(h, w, h_out, w_out, sf_h, sf_w, cdt)
    sel_itemsize = jnp.dtype(cdt).itemsize
    sel_vmem = 2 * _round_up(hw, 8) * _round_up(howo, 128) * sel_itemsize

    bytes_per_row = 2 * (_round_up(hw, 128) + _round_up(howo, 128)) * itemsize
    bp = _pick_block_rows(p, bytes_per_row, itemsize, reserved_bytes=sel_vmem)
    grid = (pl.cdiv(p, bp),)

    x2 = x.reshape(p, hw)                     # free reshape (NCHW contiguous)
    cost = pl.CostEstimate(
        flops=2 * p * hw * howo, transcendentals=0,
        bytes_accessed=(p * hw + p * howo) * itemsize + hw * howo * sel_itemsize)

    out2 = pl.pallas_call(
        _flat_copy_kernel,
        out_shape=jax.ShapeDtypeStruct((p, howo), x.dtype),
        grid_spec=pltpu.PrefetchScalarGridSpec(
            num_scalar_prefetch=0,
            grid=grid,
            in_specs=[pl.BlockSpec((bp, hw), lambda i: (i, 0)),
                      pl.BlockSpec((hw, howo), lambda i: (0, 0))],  # resident
            out_specs=pl.BlockSpec((bp, howo), lambda i: (i, 0)),
        ),
        compiler_params=pltpu.CompilerParams(
            dimension_semantics=("parallel",),
            vmem_limit_bytes=_VMEM_LIMIT),
        cost_estimate=cost,
    )(x2, sel)
    return out2.reshape(n, c, h_out, w_out)   # free reshape


# ---------------------------------------------------------------------------
# Path 2: integer scale factors, large W — row-slab kernel.
# ---------------------------------------------------------------------------
def _row_repeat_kernel(x_ref, csel_ref, o_ref, *, sf_h, sf_w):
    """x_ref: (R, W); csel_ref: (CW, CW*sf_w) one-hot; o: (R, sf_h*W*sf_w).

    Column interleave = block-diagonal matmul over 128-wide column chunks;
    row repeat = sf_h direct slice stores into the lane-dense output block."""
    csel = csel_ref[...]
    w = x_ref.shape[1]
    w_out = w * sf_w
    cw0 = csel.shape[0]
    n_chunks = (w + cw0 - 1) // cw0
    for k in range(n_chunks):
        lo = k * cw0
        cw = min(cw0, w - lo)
        xk = x_ref[:, lo:lo + cw].astype(csel.dtype)
        sk = csel if cw == cw0 else csel[:cw, :cw * sf_w]
        yk = jnp.dot(xk, sk, preferred_element_type=jnp.float32).astype(o_ref.dtype)
        for r in range(sf_h):
            base = r * w_out + lo * sf_w
            o_ref[:, base:base + cw * sf_w] = yk


def _col_selector(cw, sf_w, dtype):
    i = lax.broadcasted_iota(jnp.int32, (cw, cw * sf_w), 0)
    j = lax.broadcasted_iota(jnp.int32, (cw, cw * sf_w), 1)
    return (i == j // sf_w).astype(dtype)


def _interpolate_rows(x, sf_h, sf_w):
    n, c, h, w = x.shape
    h_out, w_out = h * sf_h, w * sf_w
    total_rows = n * c * h
    itemsize = jnp.dtype(x.dtype).itemsize
    cdt = _compute_dtype(x.dtype)
    cw = min(w, _COL_CHUNK)
    csel = _col_selector(cw, sf_w, cdt)
    sel_vmem = 2 * _round_up(cw, 8) * _round_up(cw * sf_w, 128) * jnp.dtype(cdt).itemsize

    out_minor = sf_h * w_out
    bytes_per_row = 2 * (_round_up(w, 128) + _round_up(out_minor, 128)) * itemsize
    block_rows = _pick_block_rows(total_rows, bytes_per_row, itemsize,
                                  reserved_bytes=sel_vmem)
    grid = (pl.cdiv(total_rows, block_rows),)

    x2 = x.reshape(total_rows, w)             # free reshape
    kernel = functools.partial(_row_repeat_kernel, sf_h=sf_h, sf_w=sf_w)
    cost = pl.CostEstimate(
        flops=2 * total_rows * w * cw * sf_w, transcendentals=0,
        bytes_accessed=(total_rows * w + total_rows * out_minor) * itemsize)

    out2 = pl.pallas_call(
        kernel,
        out_shape=jax.ShapeDtypeStruct((total_rows, out_minor), x.dtype),
        grid_spec=pltpu.PrefetchScalarGridSpec(
            num_scalar_prefetch=0,
            grid=grid,
            in_specs=[pl.BlockSpec((block_rows, w), lambda i: (i, 0)),
                      pl.BlockSpec((cw, cw * sf_w), lambda i: (0, 0))],  # resident
            out_specs=pl.BlockSpec((block_rows, out_minor), lambda i: (i, 0)),
        ),
        compiler_params=pltpu.CompilerParams(
            dimension_semantics=("parallel",),
            vmem_limit_bytes=_VMEM_LIMIT),
        cost_estimate=cost,
    )(x2, csel)
    # (N*C*H, sf_h*W_out) -> (N, C, H*sf_h, W_out): contiguous merge, free.
    return out2.reshape(n, c, h_out, w_out)


# ---------------------------------------------------------------------------
# Path 3: non-integer scale factors with large planes — batched per-plane
# row/col one-hot selection.
# ---------------------------------------------------------------------------
def _general_plane_kernel(x_ref, rsel_ref, csel_ref, o_ref):
    """x: (bp, H, W); rsel: (Hout, H); csel: (W, Wout); o: (bp, Hout, Wout)."""
    rsel = rsel_ref[...]
    csel = csel_ref[...]
    for p in range(x_ref.shape[0]):           # short static unroll
        xp = x_ref[p].astype(rsel.dtype)
        t = jnp.dot(rsel, xp, preferred_element_type=jnp.float32)
        y = jnp.dot(t.astype(csel.dtype), csel, preferred_element_type=jnp.float32)
        o_ref[p] = y.astype(o_ref.dtype)


def _interpolate_general(x, h_out, w_out, sf_h, sf_w):
    n, c, h, w = x.shape
    p = n * c
    itemsize = jnp.dtype(x.dtype).itemsize
    cdt = _compute_dtype(x.dtype)
    cdt_size = jnp.dtype(cdt).itemsize

    row_src = _src_indices(h_out, h, sf_h)
    col_src = _src_indices(w_out, w, sf_w)
    rsel = (lax.broadcasted_iota(jnp.int32, (h_out, h), 1)
            == row_src[:, None]).astype(cdt)
    csel = (lax.broadcasted_iota(jnp.int32, (w, w_out), 0)
            == col_src[None, :]).astype(cdt)

    sel_vmem = 2 * (_round_up(h_out, 8) * _round_up(h, 128)
                    + _round_up(w, 8) * _round_up(w_out, 128)) * cdt_size
    bytes_per_plane = 2 * (_round_up(h, 8) * _round_up(w, 128)
                           + _round_up(h_out, 8) * _round_up(w_out, 128)) * itemsize
    bp = _pick_block_rows(p, bytes_per_plane, itemsize, reserved_bytes=sel_vmem)
    bp = min(bp, 8)                            # bound the static unroll
    grid = (pl.cdiv(p, bp),)

    x3 = x.reshape(p, h, w)                    # free reshape
    cost = pl.CostEstimate(
        flops=2 * p * (h_out * h * w + h_out * w * w_out), transcendentals=0,
        bytes_accessed=(p * h * w + p * h_out * w_out) * itemsize)

    out3 = pl.pallas_call(
        _general_plane_kernel,
        out_shape=jax.ShapeDtypeStruct((p, h_out, w_out), x.dtype),
        grid_spec=pltpu.PrefetchScalarGridSpec(
            num_scalar_prefetch=0,
            grid=grid,
            in_specs=[pl.BlockSpec((bp, h, w), lambda i: (i, 0, 0)),
                      pl.BlockSpec((h_out, h), lambda i: (0, 0)),     # resident
                      pl.BlockSpec((w, w_out), lambda i: (0, 0))],    # resident
            out_specs=pl.BlockSpec((bp, h_out, w_out), lambda i: (i, 0, 0)),
        ),
        compiler_params=pltpu.CompilerParams(
            dimension_semantics=("parallel",),
            vmem_limit_bytes=_VMEM_LIMIT),
        cost_estimate=cost,
    )(x3, rsel, csel)
    return out3.reshape(n, c, h_out, w_out)


# ---------------------------------------------------------------------------
# Public wrapper (== Interpolate2D.forward).
# ---------------------------------------------------------------------------
@functools.partial(jax.jit, static_argnames=("scale_factor", "mode"))
def interpolate2d(x, *, scale_factor, mode="nearest"):
    """F.interpolate(x, scale_factor=scale_factor, mode='nearest') for NCHW."""
    if mode != "nearest":
        # TODO(synk): only mode='nearest' (the module default) is implemented.
        raise NotImplementedError("only mode='nearest' is supported")

    if isinstance(scale_factor, (tuple, list)):
        sf_h, sf_w = float(scale_factor[0]), float(scale_factor[1])
    else:
        sf_h = sf_w = float(scale_factor)

    n, c, h, w = x.shape
    h_out = int(math.floor(h * sf_h))
    w_out = int(math.floor(w * sf_w))
    if h_out <= 0 or w_out <= 0:
        raise ValueError("scale_factor too small for the input size")

    cdt_size = jnp.dtype(_compute_dtype(x.dtype)).itemsize
    flat_sel_bytes = h * w * h_out * w_out * cdt_size
    is_int = sf_h.is_integer() and sf_w.is_integer() and sf_h >= 1 and sf_w >= 1

    if flat_sel_bytes <= _FLAT_SEL_LIMIT:
        # Small planes: lane-dense flattened output, resident selector.
        return _interpolate_flat(x, h_out, w_out, sf_h, sf_w)
    if is_int:
        return _interpolate_rows(x, int(sf_h), int(sf_w))
    return _interpolate_general(x, h_out, w_out, sf_h, sf_w)


if __name__ == "__main__":
    # 1) Required shape (flat-plane path): (2, 4, 16, 16), x2 nearest upsample.
    x = jax.random.normal(jax.random.PRNGKey(0), (2, 4, 16, 16), dtype=jnp.float32)
    out = jax.block_until_ready(interpolate2d(x, scale_factor=2, mode="nearest"))
    ref = jnp.repeat(jnp.repeat(x, 2, axis=2), 2, axis=3)
    assert out.shape == (2, 4, 32, 32), out.shape
    assert jnp.array_equal(out, ref), "flat-path mismatch vs nearest reference"

    # 2) Wide rows + non-dividing row count (row-slab path, padded last block).
    x2 = jax.random.normal(jax.random.PRNGKey(1), (1, 3, 5, 256), dtype=jnp.float32)
    out2 = jax.block_until_ready(interpolate2d(x2, scale_factor=2, mode="nearest"))
    ref2 = jnp.repeat(jnp.repeat(x2, 2, axis=2), 2, axis=3)
    assert out2.shape == (1, 3, 10, 512), out2.shape
    assert jnp.array_equal(out2, ref2), "row-path mismatch vs nearest reference"

    # 3) Non-integer scale, small plane (flat path with general selector).
    x3 = jax.random.normal(jax.random.PRNGKey(2), (2, 4, 16, 16), dtype=jnp.float32)
    out3 = jax.block_until_ready(interpolate2d(x3, scale_factor=1.5, mode="nearest"))
    rs3 = _src_indices(24, 16, 1.5)
    ref3 = x3[:, :, rs3, :][:, :, :, rs3]
    assert out3.shape == (2, 4, 24, 24), out3.shape
    assert jnp.array_equal(out3, ref3), "flat-general mismatch vs reference"

    # 4) Non-integer scale, larger plane (batched per-plane general path).
    x4 = jax.random.normal(jax.random.PRNGKey(3), (1, 2, 48, 48), dtype=jnp.float32)
    out4 = jax.block_until_ready(interpolate2d(x4, scale_factor=1.5, mode="nearest"))
    rs4 = _src_indices(72, 48, 1.5)
    ref4 = x4[:, :, rs4, :][:, :, :, rs4]
    assert out4.shape == (1, 2, 72, 72), out4.shape
    assert jnp.array_equal(out4, ref4), "general-path mismatch vs reference"

    print("KERNEL_OK")
</pallas_src>

<mosaic_0001>
module attributes {stable_mosaic.version = 11 : i64} {
  func.func @_flat_copy_kernel(%arg0: i32, %arg1: memref<8x256xf32, #tpu.memory_space<vmem>>, %arg2: memref<256x1024xf32, #tpu.memory_space<vmem>>, %arg3: memref<8x1024xf32, #tpu.memory_space<vmem>>) attributes {dimension_semantics = [#tpu.dimension_semantics<parallel>], iteration_bounds = array<i64: 1>, scalar_prefetch = 0 : i64, scratch_operands = 0 : i64, tpu.core_type = #tpu.core_type<tc>, window_params = [{transform_indices = @transform_0, window_bounds = array<i64: 8, 256>}, {pipeline_mode = #tpu.pipeline_mode<synchronous>, transform_indices = @transform_1, window_bounds = array<i64: 256, 1024>}, {transform_indices = @transform_2, window_bounds = array<i64: 8, 1024>}]} {
    %c0 = arith.constant 0 : index
    %c0_0 = arith.constant 0 : index
    %0 = vector.load %arg2[%c0, %c0_0] : memref<256x1024xf32, #tpu.memory_space<vmem>>, vector<256x1024xf32>
    %c0_1 = arith.constant 0 : index
    %c0_2 = arith.constant 0 : index
    %1 = vector.load %arg1[%c0_1, %c0_2] : memref<8x256xf32, #tpu.memory_space<vmem>>, vector<8x256xf32>
    %cst = arith.constant dense<0.000000e+00> : vector<8x1024xf32>
    %2 = tpu.matmul %1, %0, %cst {dimension_numbers = #tpu.dot_dimension_numbers<[1], [0], [0], [1], [0, 0, 1, 1], [], []>} : vector<8x256xf32>, vector<256x1024xf32>, vector<8x1024xf32> -> vector<8x1024xf32>
    %c0_3 = arith.constant 0 : index
    %c0_4 = arith.constant 0 : index
    %3 = vector.load %arg3[%c0_3, %c0_4] : memref<8x1024xf32, #tpu.memory_space<vmem>>, vector<8x1024xf32>
    tpu.vector_store %arg3[%c0_3, %c0_4], %2 {strides = array<i32>} : memref<8x1024xf32, #tpu.memory_space<vmem>>, vector<8x1024xf32>,
    return
  }
  func.func @transform_0(%arg0: i32) -> (i32, i32) {
    %c0_i32 = arith.constant 0 : i32
    %c0_i32_0 = arith.constant 0 : i32
    return %arg0, %c0_i32 : i32, i32
  }
  func.func @transform_1(%arg0: i32) -> (i32, i32) {
    %c0_i32 = arith.constant 0 : i32
    %c0_i32_0 = arith.constant 0 : i32
    %c0_i32_1 = arith.constant 0 : i32
    return %c0_i32, %c0_i32_0 : i32, i32
  }
  func.func @transform_2(%arg0: i32) -> (i32, i32) {
    %c0_i32 = arith.constant 0 : i32
    %c0_i32_0 = arith.constant 0 : i32
    return %arg0, %c0_i32 : i32, i32
  }
}

</mosaic_0001>

<bundles_post_ra>
// kernel: interpolate2d.1
= control target key start
LH: loop header
LB: loop body
LE: loop exit
PB: predicated region body
PF: predicated region fallthrough
CT: control target
= control target key end

     0   :  { %s1434_s1 = inlined_call_operand.vmem [shape: f32[256,1024], index: 1, kind: input, shape index: {}]   ;;  %s1435_s0 = inlined_call_operand.vmem [shape: f32[8,256], index: 0, kind: input, shape index: {}]   ;;  %s1436_s2 = inlined_call_operand.vmem [shape: f32[8,1024], index: 2, kind: output, shape index: {}]  }
   0x1   :  { %v132_v0 = vld [vmem:[%s1434_s1 + $0x3c8] sm:$0xff]  ;;  %v131_v6 = vld [vmem:[%s1434_s1 + $0x3c0] sm:$0xff]  ;;  %v134_v60 = vld [vmem:[%s1434_s1 + $0x3d8] sm:$0xff] }
   0x2   :  { %v260_v1 = vld [vmem:[%s1434_s1 + $0x7c8] sm:$0xff]  ;;  %309 = vmatpush.msra.mxu2 %v132_v0  ;;  %v259_v7 = vld [vmem:[%s1434_s1 + $0x7c0] sm:$0xff]  ;;  %269 = vmatpush.msra.mxu0 %v131_v6  ;;  %v262_v61 = vld [vmem:[%s1434_s1 + $0x7d8] sm:$0xff] }
   0x3   :  { %v124_v2 = vld [vmem:[%s1434_s1 + $0x388] sm:$0xff]  ;;  %329 = vmatpush.msra.mxu3 %v260_v1  ;;  %v123_v8 = vld [vmem:[%s1434_s1 + $0x380] sm:$0xff]  ;;  %289 = vmatpush.msra.mxu1 %v259_v7  ;;  %v126_v0 = vld [vmem:[%s1434_s1 + $0x398] sm:$0xff] }
   0x4   :  { %v252_v3 = vld [vmem:[%s1434_s1 + $0x788] sm:$0xff]  ;;  %310 = vmatpush.msra.mxu2 %v124_v2  ;;  %v251_v9 = vld [vmem:[%s1434_s1 + $0x780] sm:$0xff]  ;;  %270 = vmatpush.msra.mxu0 %v123_v8  ;;  %v254_v1 = vld [vmem:[%s1434_s1 + $0x798] sm:$0xff] }
   0x5   :  { %v116_v4 = vld [vmem:[%s1434_s1 + $0x348] sm:$0xff]  ;;  %330 = vmatpush.msra.mxu3 %v252_v3  ;;  %v115_v12 = vld [vmem:[%s1434_s1 + $0x340] sm:$0xff]  ;;  %290 = vmatpush.msra.mxu1 %v251_v9  ;;  %v133_v6 = vld [vmem:[%s1434_s1 + $0x3d0] sm:$0xff] }
   0x6   :  { %v244_v5 = vld [vmem:[%s1434_s1 + $0x748] sm:$0xff]  ;;  %311 = vmatpush.msra.mxu2 %v116_v4  ;;  %v243_v13 = vld [vmem:[%s1434_s1 + $0x740] sm:$0xff]  ;;  %271 = vmatpush.msra.mxu0 %v115_v12  ;;  %v118_v4 = vld [vmem:[%s1434_s1 + $0x358] sm:$0xff] }
   0x7   :  { %v108_v10 = vld [vmem:[%s1434_s1 + $0x308] sm:$0xff]  ;;  %331 = vmatpush.msra.mxu3 %v244_v5  ;;  %v107_v16 = vld [vmem:[%s1434_s1 + $0x300] sm:$0xff]  ;;  %291 = vmatpush.msra.mxu1 %v243_v13  ;;  %v246_v5 = vld [vmem:[%s1434_s1 + $0x758] sm:$0xff] }
   0x8   :  { %v236_v11 = vld [vmem:[%s1434_s1 + $0x708] sm:$0xff]  ;;  %312 = vmatpush.msra.mxu2 %v108_v10  ;;  %v235_v17 = vld [vmem:[%s1434_s1 + $0x700] sm:$0xff]  ;;  %272 = vmatpush.msra.mxu0 %v107_v16  ;;  %v261_v7 = vld [vmem:[%s1434_s1 + $0x7d0] sm:$0xff] }
   0x9   :  { %v100_v14 = vld [vmem:[%s1434_s1 + $0x2c8] sm:$0xff]  ;;  %332 = vmatpush.msra.mxu3 %v236_v11  ;;  %v99_v20 = vld [vmem:[%s1434_s1 + $0x2c0] sm:$0xff]  ;;  %292 = vmatpush.msra.mxu1 %v235_v17  ;;  %v110_v8 = vld [vmem:[%s1434_s1 + $0x318] sm:$0xff] }
   0xa   :  { %v228_v15 = vld [vmem:[%s1434_s1 + $0x6c8] sm:$0xff]  ;;  %313 = vmatpush.msra.mxu2 %v100_v14  ;;  %v227_v21 = vld [vmem:[%s1434_s1 + $0x6c0] sm:$0xff]  ;;  %273 = vmatpush.msra.mxu0 %v99_v20  ;;  %v238_v9 = vld [vmem:[%s1434_s1 + $0x718] sm:$0xff] }
   0xb   :  { %v92_v18 = vld [vmem:[%s1434_s1 + $0x288] sm:$0xff]  ;;  %333 = vmatpush.msra.mxu3 %v228_v15  ;;  %v91_v24 = vld [vmem:[%s1434_s1 + $0x280] sm:$0xff]  ;;  %293 = vmatpush.msra.mxu1 %v227_v21  ;;  %v125_v10 = vld [vmem:[%s1434_s1 + $0x390] sm:$0xff] }
   0xc   :  { %v220_v19 = vld [vmem:[%s1434_s1 + $0x688] sm:$0xff]  ;;  %314 = vmatpush.msra.mxu2 %v92_v18  ;;  %v219_v25 = vld [vmem:[%s1434_s1 + $0x680] sm:$0xff]  ;;  %274 = vmatpush.msra.mxu0 %v91_v24  ;;  %v253_v11 = vld [vmem:[%s1434_s1 + $0x790] sm:$0xff] }
   0xd   :  { %v84_v22 = vld [vmem:[%s1434_s1 + $0x248] sm:$0xff]  ;;  %334 = vmatpush.msra.mxu3 %v220_v19  ;;  %v83_v28 = vld [vmem:[%s1434_s1 + $0x240] sm:$0xff]  ;;  %294 = vmatpush.msra.mxu1 %v219_v25  ;;  %v102_v12 = vld [vmem:[%s1434_s1 + $0x2d8] sm:$0xff] }
   0xe   :  { %v212_v23 = vld [vmem:[%s1434_s1 + $0x648] sm:$0xff]  ;;  %315 = vmatpush.msra.mxu2 %v84_v22  ;;  %v211_v29 = vld [vmem:[%s1434_s1 + $0x640] sm:$0xff]  ;;  %275 = vmatpush.msra.mxu0 %v83_v28  ;;  %v230_v13 = vld [vmem:[%s1434_s1 + $0x6d8] sm:$0xff] }
   0xf   :  { %v76_v26 = vld [vmem:[%s1434_s1 + $0x208] sm:$0xff]  ;;  %335 = vmatpush.msra.mxu3 %v212_v23  ;;  %v75_v32 = vld [vmem:[%s1434_s1 + $0x200] sm:$0xff]  ;;  %295 = vmatpush.msra.mxu1 %v211_v29  ;;  %v117_v14 = vld [vmem:[%s1434_s1 + $0x350] sm:$0xff] }
  0x10   :  { %v204_v27 = vld [vmem:[%s1434_s1 + $0x608] sm:$0xff]  ;;  %316 = vmatpush.msra.mxu2 %v76_v26  ;;  %v203_v33 = vld [vmem:[%s1434_s1 + $0x600] sm:$0xff]  ;;  %276 = vmatpush.msra.mxu0 %v75_v32  ;;  %v245_v15 = vld [vmem:[%s1434_s1 + $0x750] sm:$0xff] }
  0x11   :  { %v68_v30 = vld [vmem:[%s1434_s1 + $0x1c8] sm:$0xff]  ;;  %336 = vmatpush.msra.mxu3 %v204_v27  ;;  %v67_v36 = vld [vmem:[%s1434_s1 + $0x1c0] sm:$0xff]  ;;  %296 = vmatpush.msra.mxu1 %v203_v33  ;;  %v94_v16 = vld [vmem:[%s1434_s1 + $0x298] sm:$0xff] }
  0x12   :  { %v196_v31 = vld [vmem:[%s1434_s1 + $0x5c8] sm:$0xff]  ;;  %317 = vmatpush.msra.mxu2 %v68_v30  ;;  %v195_v37 = vld [vmem:[%s1434_s1 + $0x5c0] sm:$0xff]  ;;  %277 = vmatpush.msra.mxu0 %v67_v36  ;;  %v222_v17 = vld [vmem:[%s1434_s1 + $0x698] sm:$0xff] }
  0x13   :  { %v60_v34 = vld [vmem:[%s1434_s1 + $0x188] sm:$0xff]  ;;  %337 = vmatpush.msra.mxu3 %v196_v31  ;;  %v59_v40 = vld [vmem:[%s1434_s1 + $0x180] sm:$0xff]  ;;  %297 = vmatpush.msra.mxu1 %v195_v37  ;;  %v109_v18 = vld [vmem:[%s1434_s1 + $0x310] sm:$0xff] }
  0x14   :  { %v188_v35 = vld [vmem:[%s1434_s1 + $0x588] sm:$0xff]  ;;  %318 = vmatpush.msra.mxu2 %v60_v34  ;;  %v187_v41 = vld [vmem:[%s1434_s1 + $0x580] sm:$0xff]  ;;  %278 = vmatpush.msra.mxu0 %v59_v40  ;;  %v237_v19 = vld [vmem:[%s1434_s1 + $0x710] sm:$0xff] }
  0x15   :  { %v52_v38 = vld [vmem:[%s1434_s1 + $0x148] sm:$0xff]  ;;  %338 = vmatpush.msra.mxu3 %v188_v35  ;;  %v51_v44 = vld [vmem:[%s1434_s1 + $0x140] sm:$0xff]  ;;  %298 = vmatpush.msra.mxu1 %v187_v41  ;;  %v86_v20 = vld [vmem:[%s1434_s1 + $0x258] sm:$0xff] }
  0x16   :  { %v180_v39 = vld [vmem:[%s1434_s1 + $0x548] sm:$0xff]  ;;  %319 = vmatpush.msra.mxu2 %v52_v38  ;;  %v179_v45 = vld [vmem:[%s1434_s1 + $0x540] sm:$0xff]  ;;  %279 = vmatpush.msra.mxu0 %v51_v44  ;;  %v214_v21 = vld [vmem:[%s1434_s1 + $0x658] sm:$0xff] }
  0x17   :  { %v44_v42 = vld [vmem:[%s1434_s1 + $0x108] sm:$0xff]  ;;  %339 = vmatpush.msra.mxu3 %v180_v39  ;;  %v43_v48 = vld [vmem:[%s1434_s1 + $0x100] sm:$0xff]  ;;  %299 = vmatpush.msra.mxu1 %v179_v45  ;;  %v101_v22 = vld [vmem:[%s1434_s1 + $0x2d0] sm:$0xff] }
  0x18   :  { %v172_v43 = vld [vmem:[%s1434_s1 + $0x508] sm:$0xff]  ;;  %320 = vmatpush.msra.mxu2 %v44_v42  ;;  %v171_v49 = vld [vmem:[%s1434_s1 + $0x500] sm:$0xff]  ;;  %280 = vmatpush.msra.mxu0 %v43_v48  ;;  %v229_v23 = vld [vmem:[%s1434_s1 + $0x6d0] sm:$0xff] }
  0x19   :  { %v36_v46 = vld [vmem:[%s1434_s1 + $0xc8] sm:$0xff]  ;;  %340 = vmatpush.msra.mxu3 %v172_v43  ;;  %v35_v52 = vld [vmem:[%s1434_s1 + $0xc0] sm:$0xff]  ;;  %300 = vmatpush.msra.mxu1 %v171_v49  ;;  %v78_v24 = vld [vmem:[%s1434_s1 + $0x218] sm:$0xff] }
  0x1a   :  { %v164_v47 = vld [vmem:[%s1434_s1 + $0x4c8] sm:$0xff]  ;;  %321 = vmatpush.msra.mxu2 %v36_v46  ;;  %v163_v53 = vld [vmem:[%s1434_s1 + $0x4c0] sm:$0xff]  ;;  %281 = vmatpush.msra.mxu0 %v35_v52  ;;  %v206_v25 = vld [vmem:[%s1434_s1 + $0x618] sm:$0xff] }
  0x1b   :  { %v28_v50 = vld [vmem:[%s1434_s1 + $0x88] sm:$0xff]  ;;  %341 = vmatpush.msra.mxu3 %v164_v47  ;;  %v27_v56 = vld [vmem:[%s1434_s1 + $0x80] sm:$0xff]  ;;  %301 = vmatpush.msra.mxu1 %v163_v53  ;;  %v93_v26 = vld [vmem:[%s1434_s1 + $0x290] sm:$0xff] }
  0x1c   :  { %v156_v51 = vld [vmem:[%s1434_s1 + $0x488] sm:$0xff]  ;;  %322 = vmatpush.msra.mxu2 %v28_v50  ;;  %v155_v57 = vld [vmem:[%s1434_s1 + $0x480] sm:$0xff]  ;;  %282 = vmatpush.msra.mxu0 %v27_v56  ;;  %v221_v27 = vld [vmem:[%s1434_s1 + $0x690] sm:$0xff] }
  0x1d   :  { %v20_v54 = vld [vmem:[%s1434_s1 + $0x48] sm:$0xff]  ;;  %342 = vmatpush.msra.mxu3 %v156_v51  ;;  %302 = vmatpush.msra.mxu1 %v155_v57  ;;  %v19_v62 = vld [vmem:[%s1434_s1 + $0x40] sm:$0xff]  ;;  %v70_v28 = vld [vmem:[%s1434_s1 + $0x1d8] sm:$0xff] }
  0x1e   :  { %v148_v55 = vld [vmem:[%s1434_s1 + $0x448] sm:$0xff]  ;;  %323 = vmatpush.msra.mxu2 %v20_v54  ;;  %v147_v63 = vld [vmem:[%s1434_s1 + $0x440] sm:$0xff]  ;;  %283 = vmatpush.msra.mxu0 %v19_v62  ;;  %v198_v29 = vld [vmem:[%s1434_s1 + $0x5d8] sm:$0xff] }
  0x1f   :  { %v12_v58 = vld [vmem:[%s1434_s1 + $0x8] sm:$0xff]  ;;  %343 = vmatpush.msra.mxu3 %v148_v55  ;;  %v11_v2 = vld [vmem:[%s1434_s1] sm:$0xff]  ;;  %303 = vmatpush.msra.mxu1 %v147_v63  ;;  %v85_v30 = vld [vmem:[%s1434_s1 + $0x250] sm:$0xff] }
  0x20   :  { %v140_v59 = vld [vmem:[%s1434_s1 + $0x408] sm:$0xff]  ;;  %324 = vmatpush.msra.mxu2 %v12_v58  ;;  %v139_v3 = vld [vmem:[%s1434_s1 + $0x400] sm:$0xff]  ;;  %284 = vmatpush.msra.mxu0 %v11_v2  ;;  %v213_v31 = vld [vmem:[%s1434_s1 + $0x650] sm:$0xff] }
  0x21   :  { %344 = vmatpush.msra.mxu3 %v140_v59  ;;  %304 = vmatpush.msra.mxu1 %v139_v3  ;;  %v62_v32 = vld [vmem:[%s1434_s1 + $0x198] sm:$0xff]  ;;  %v77_v34 = vld [vmem:[%s1434_s1 + $0x210] sm:$0xff]  ;;  %v985_v58 = vld [vmem:[%s1435_s0] sm:$0xff] }
  0x22   :  { %389 = vmatpush.msrb.mxu2 %v134_v60  ;;  %349 = vmatpush.msrb.mxu0 %v133_v6  ;;  %v190_v33 = vld [vmem:[%s1434_s1 + $0x598] sm:$0xff]  ;;  %v205_v35 = vld [vmem:[%s1434_s1 + $0x610] sm:$0xff]  ;;  %v990_v59 = vld [vmem:[%s1435_s0 + $0x8] sm:$0xff] }
  0x23   :  { %409 = vmatpush.msrb.mxu3 %v262_v61  ;;  %369 = vmatpush.msrb.mxu1 %v261_v7  ;;  %v54_v36 = vld [vmem:[%s1434_s1 + $0x158] sm:$0xff]  ;;  %v69_v38 = vld [vmem:[%s1434_s1 + $0x1d0] sm:$0xff]  ;;  %v136_v60 = vld [vmem:[%s1434_s1 + $0x3e8] sm:$0xff] }
  0x24   :  { %390 = vmatpush.msrb.mxu2 %v126_v0  ;;  %350 = vmatpush.msrb.mxu0 %v125_v10  ;;  %v182_v37 = vld [vmem:[%s1434_s1 + $0x558] sm:$0xff]  ;;  %v197_v39 = vld [vmem:[%s1434_s1 + $0x5d0] sm:$0xff]  ;;  %v264_v61 = vld [vmem:[%s1434_s1 + $0x7e8] sm:$0xff] }
  0x25   :  { %410 = vmatpush.msrb.mxu3 %v254_v1  ;;  %370 = vmatpush.msrb.mxu1 %v253_v11  ;;  %v46_v40 = vld [vmem:[%s1434_s1 + $0x118] sm:$0xff]  ;;  %v61_v42 = vld [vmem:[%s1434_s1 + $0x190] sm:$0xff]  ;;  %v128_v0 = vld [vmem:[%s1434_s1 + $0x3a8] sm:$0xff] }
  0x26   :  { %391 = vmatpush.msrb.mxu2 %v118_v4  ;;  %351 = vmatpush.msrb.mxu0 %v117_v14  ;;  %v174_v41 = vld [vmem:[%s1434_s1 + $0x518] sm:$0xff]  ;;  %v189_v43 = vld [vmem:[%s1434_s1 + $0x590] sm:$0xff]  ;;  %v256_v1 = vld [vmem:[%s1434_s1 + $0x7a8] sm:$0xff] }
  0x27   :  { %411 = vmatpush.msrb.mxu3 %v246_v5  ;;  %371 = vmatpush.msrb.mxu1 %v245_v15  ;;  %v38_v44 = vld [vmem:[%s1434_s1 + $0xd8] sm:$0xff]  ;;  %v53_v46 = vld [vmem:[%s1434_s1 + $0x150] sm:$0xff]  ;;  %v120_v4 = vld [vmem:[%s1434_s1 + $0x368] sm:$0xff] }
  0x28   :  { %392 = vmatpush.msrb.mxu2 %v110_v8  ;;  %352 = vmatpush.msrb.mxu0 %v109_v18  ;;  %v166_v45 = vld [vmem:[%s1434_s1 + $0x4d8] sm:$0xff]  ;;  %v181_v47 = vld [vmem:[%s1434_s1 + $0x550] sm:$0xff]  ;;  %v248_v5 = vld [vmem:[%s1434_s1 + $0x768] sm:$0xff] }
  0x29   :  { %412 = vmatpush.msrb.mxu3 %v238_v9  ;;  %372 = vmatpush.msrb.mxu1 %v237_v19  ;;  %v30_v48 = vld [vmem:[%s1434_s1 + $0x98] sm:$0xff]  ;;  %v45_v50 = vld [vmem:[%s1434_s1 + $0x110] sm:$0xff]  ;;  %v135_v8 = vld [vmem:[%s1434_s1 + $0x3e0] sm:$0xff] }
  0x2a   :  { %393 = vmatpush.msrb.mxu2 %v102_v12  ;;  %353 = vmatpush.msrb.mxu0 %v101_v22  ;;  %v158_v49 = vld [vmem:[%s1434_s1 + $0x498] sm:$0xff]  ;;  %v173_v51 = vld [vmem:[%s1434_s1 + $0x510] sm:$0xff]  ;;  %v263_v9 = vld [vmem:[%s1434_s1 + $0x7e0] sm:$0xff] }
  0x2b   :  { %413 = vmatpush.msrb.mxu3 %v230_v13  ;;  %373 = vmatpush.msrb.mxu1 %v229_v23  ;;  %v22_v52 = vld [vmem:[%s1434_s1 + $0x58] sm:$0xff]  ;;  %v37_v54 = vld [vmem:[%s1434_s1 + $0xd0] sm:$0xff]  ;;  %v112_v10 = vld [vmem:[%s1434_s1 + $0x328] sm:$0xff] }
  0x2c   :  { %394 = vmatpush.msrb.mxu2 %v94_v16  ;;  %354 = vmatpush.msrb.mxu0 %v93_v26  ;;  %v150_v53 = vld [vmem:[%s1434_s1 + $0x458] sm:$0xff]  ;;  %v165_v55 = vld [vmem:[%s1434_s1 + $0x4d0] sm:$0xff]  ;;  %v240_v11 = vld [vmem:[%s1434_s1 + $0x728] sm:$0xff] }
  0x2d   :  { %414 = vmatpush.msrb.mxu3 %v222_v17  ;;  %374 = vmatpush.msrb.mxu1 %v221_v27  ;;  %v14_v56 = vld [vmem:[%s1434_s1 + $0x18] sm:$0xff]  ;;  %v29_v62 = vld [vmem:[%s1434_s1 + $0x90] sm:$0xff]  ;;  %v127_v12 = vld [vmem:[%s1434_s1 + $0x3a0] sm:$0xff] }
  0x2e   :  { %395 = vmatpush.msrb.mxu2 %v86_v20  ;;  %355 = vmatpush.msrb.mxu0 %v85_v30  ;;  %v142_v57 = vld [vmem:[%s1434_s1 + $0x418] sm:$0xff]  ;;  %v157_v63 = vld [vmem:[%s1434_s1 + $0x490] sm:$0xff]  ;;  %v255_v13 = vld [vmem:[%s1434_s1 + $0x7a0] sm:$0xff] }
  0x2f   :  { %415 = vmatpush.msrb.mxu3 %v214_v21  ;;  %375 = vmatpush.msrb.mxu1 %v213_v31  ;;  %v21_v2 = vld [vmem:[%s1434_s1 + $0x50] sm:$0xff]  ;;  %v104_v14 = vld [vmem:[%s1434_s1 + $0x2e8] sm:$0xff]  ;;  %v119_v16 = vld [vmem:[%s1434_s1 + $0x360] sm:$0xff] }
  0x30   :  { %396 = vmatpush.msrb.mxu2 %v78_v24  ;;  %356 = vmatpush.msrb.mxu0 %v77_v34  ;;  %v149_v3 = vld [vmem:[%s1434_s1 + $0x450] sm:$0xff]  ;;  %v232_v15 = vld [vmem:[%s1434_s1 + $0x6e8] sm:$0xff]  ;;  %v247_v17 = vld [vmem:[%s1434_s1 + $0x760] sm:$0xff] }
  0x31   :  { %416 = vmatpush.msrb.mxu3 %v206_v25  ;;  %376 = vmatpush.msrb.mxu1 %v205_v35  ;;  %v13_v6 = vld [vmem:[%s1434_s1 + $0x10] sm:$0xff]  ;;  %v96_v18 = vld [vmem:[%s1434_s1 + $0x2a8] sm:$0xff]  ;;  %v111_v20 = vld [vmem:[%s1434_s1 + $0x320] sm:$0xff] }
  0x32   :  { %397 = vmatpush.msrb.mxu2 %v70_v28  ;;  %357 = vmatpush.msrb.mxu0 %v69_v38  ;;  %v141_v7 = vld [vmem:[%s1434_s1 + $0x410] sm:$0xff]  ;;  %v224_v19 = vld [vmem:[%s1434_s1 + $0x6a8] sm:$0xff]  ;;  %v239_v21 = vld [vmem:[%s1434_s1 + $0x720] sm:$0xff] }
  0x33   :  { %417 = vmatpush.msrb.mxu3 %v198_v29  ;;  %377 = vmatpush.msrb.mxu1 %v197_v39  ;;  %v88_v22 = vld [vmem:[%s1434_s1 + $0x268] sm:$0xff]  ;;  %v103_v24 = vld [vmem:[%s1434_s1 + $0x2e0] sm:$0xff] }
  0x34   :  { %398 = vmatpush.msrb.mxu2 %v62_v32  ;;  %358 = vmatpush.msrb.mxu0 %v61_v42  ;;  %v216_v23 = vld [vmem:[%s1434_s1 + $0x668] sm:$0xff]  ;;  %v231_v25 = vld [vmem:[%s1434_s1 + $0x6e0] sm:$0xff] }
  0x35   :  { %418 = vmatpush.msrb.mxu3 %v190_v33  ;;  %378 = vmatpush.msrb.mxu1 %v189_v43  ;;  %v80_v26 = vld [vmem:[%s1434_s1 + $0x228] sm:$0xff]  ;;  %v95_v28 = vld [vmem:[%s1434_s1 + $0x2a0] sm:$0xff] }
  0x36   :  { %399 = vmatpush.msrb.mxu2 %v54_v36  ;;  %359 = vmatpush.msrb.mxu0 %v53_v46  ;;  %v208_v27 = vld [vmem:[%s1434_s1 + $0x628] sm:$0xff]  ;;  %v223_v29 = vld [vmem:[%s1434_s1 + $0x6a0] sm:$0xff] }
  0x37   :  { %419 = vmatpush.msrb.mxu3 %v182_v37  ;;  %379 = vmatpush.msrb.mxu1 %v181_v47  ;;  %v72_v30 = vld [vmem:[%s1434_s1 + $0x1e8] sm:$0xff]  ;;  %v87_v32 = vld [vmem:[%s1434_s1 + $0x260] sm:$0xff] }
  0x38   :  { %400 = vmatpush.msrb.mxu2 %v46_v40  ;;  %360 = vmatpush.msrb.mxu0 %v45_v50  ;;  %v200_v31 = vld [vmem:[%s1434_s1 + $0x5e8] sm:$0xff]  ;;  %v215_v33 = vld [vmem:[%s1434_s1 + $0x660] sm:$0xff] }
  0x39   :  { %420 = vmatpush.msrb.mxu3 %v174_v41  ;;  %380 = vmatpush.msrb.mxu1 %v173_v51  ;;  %v64_v34 = vld [vmem:[%s1434_s1 + $0x1a8] sm:$0xff]  ;;  %v79_v36 = vld [vmem:[%s1434_s1 + $0x220] sm:$0xff] }
  0x3a   :  { %401 = vmatpush.msrb.mxu2 %v38_v44  ;;  %361 = vmatpush.msrb.mxu0 %v37_v54  ;;  %v192_v35 = vld [vmem:[%s1434_s1 + $0x5a8] sm:$0xff]  ;;  %v207_v37 = vld [vmem:[%s1434_s1 + $0x620] sm:$0xff] }
  0x3b   :  { %421 = vmatpush.msrb.mxu3 %v166_v45  ;;  %381 = vmatpush.msrb.mxu1 %v165_v55  ;;  %v56_v38 = vld [vmem:[%s1434_s1 + $0x168] sm:$0xff]  ;;  %v71_v40 = vld [vmem:[%s1434_s1 + $0x1e0] sm:$0xff] }
  0x3c   :  { %402 = vmatpush.msrb.mxu2 %v30_v48  ;;  %345 = vmatmul.f32.vlgmr.msra.gmra.mxu3 %v990_v59  ;;  %v184_v39 = vld [vmem:[%s1434_s1 + $0x568] sm:$0xff]  ;;  %v199_v41 = vld [vmem:[%s1434_s1 + $0x5e0] sm:$0xff] }
  0x3d   :  { %422 = vmatpush.msrb.mxu3 %v158_v49  ;;  %325 = vmatmul.f32.vlgmr.msra.gmra.mxu2 %v985_v58  ;;  %v48_v42 = vld [vmem:[%s1434_s1 + $0x128] sm:$0xff]  ;;  %v63_v44 = vld [vmem:[%s1434_s1 + $0x1a0] sm:$0xff] }
  0x3e   :  { %403 = vmatpush.msrb.mxu2 %v22_v52  ;;  %362 = vmatpush.msrb.mxu0 %v29_v62  ;;  %v176_v43 = vld [vmem:[%s1434_s1 + $0x528] sm:$0xff]  ;;  %v191_v45 = vld [vmem:[%s1434_s1 + $0x5a0] sm:$0xff]  ;;  %v138_v62 = vld [vmem:[%s1434_s1 + $0x3f8] sm:$0xff] }
  0x3f   :  { %423 = vmatpush.msrb.mxu3 %v150_v53  ;;  %382 = vmatpush.msrb.mxu1 %v157_v63  ;;  %v40_v46 = vld [vmem:[%s1434_s1 + $0xe8] sm:$0xff]  ;;  %v55_v48 = vld [vmem:[%s1434_s1 + $0x160] sm:$0xff]  ;;  %v266_v63 = vld [vmem:[%s1434_s1 + $0x7f8] sm:$0xff] }
  0x40   :  { %404 = vmatpush.msrb.mxu2 %v14_v56  ;;  %363 = vmatpush.msrb.mxu0 %v21_v2  ;;  %v168_v47 = vld [vmem:[%s1434_s1 + $0x4e8] sm:$0xff]  ;;  %v183_v49 = vld [vmem:[%s1434_s1 + $0x560] sm:$0xff]  ;;  %v130_v2 = vld [vmem:[%s1434_s1 + $0x3b8] sm:$0xff] }
  0x41   :  { %424 = vmatpush.msrb.mxu3 %v142_v57  ;;  %383 = vmatpush.msrb.mxu1 %v149_v3  ;;  %v32_v50 = vld [vmem:[%s1434_s1 + $0xa8] sm:$0xff]  ;;  %v47_v52 = vld [vmem:[%s1434_s1 + $0x120] sm:$0xff]  ;;  %v258_v3 = vld [vmem:[%s1434_s1 + $0x7b8] sm:$0xff] }
  0x42   :  { %469 = vmatpush.msra.mxu2 %v136_v60  ;;  %364 = vmatpush.msrb.mxu0 %v13_v6  ;;  %v160_v51 = vld [vmem:[%s1434_s1 + $0x4a8] sm:$0xff]  ;;  %v175_v53 = vld [vmem:[%s1434_s1 + $0x520] sm:$0xff]  ;;  %v122_v6 = vld [vmem:[%s1434_s1 + $0x378] sm:$0xff] }
  0x43   :  { %489 = vmatpush.msra.mxu3 %v264_v61  ;;  %384 = vmatpush.msrb.mxu1 %v141_v7  ;;  %v24_v54 = vld [vmem:[%s1434_s1 + $0x68] sm:$0xff]  ;;  %v39_v56 = vld [vmem:[%s1434_s1 + $0xe0] sm:$0xff]  ;;  %v250_v7 = vld [vmem:[%s1434_s1 + $0x778] sm:$0xff] }
  0x44   :  { %470 = vmatpush.msra.mxu2 %v128_v0  ;;  %285 = vmatmul.f32.vlgmr.msra.gmra.mxu0 %v985_v58  ;;  %v152_v55 = vld [vmem:[%s1434_s1 + $0x468] sm:$0xff]  ;;  %v167_v57 = vld [vmem:[%s1434_s1 + $0x4e0] sm:$0xff] }
  0x45   :  { %490 = vmatpush.msra.mxu3 %v256_v1  ;;  %305 = vmatmul.f32.vlgmr.msra.gmra.mxu1 %v990_v59  ;;  %v16_v60 = vld [vmem:[%s1434_s1 + $0x28] sm:$0xff]  ;;  %v31_v0 = vld [vmem:[%s1434_s1 + $0xa0] sm:$0xff] }
  0x46   :  { %471 = vmatpush.msra.mxu2 %v120_v4  ;;  %429 = vmatpush.msra.mxu0 %v135_v8  ;;  %v144_v61 = vld [vmem:[%s1434_s1 + $0x428] sm:$0xff]  ;;  %v159_v1 = vld [vmem:[%s1434_s1 + $0x4a0] sm:$0xff] }
  0x47   :  { %491 = vmatpush.msra.mxu3 %v248_v5  ;;  %449 = vmatpush.msra.mxu1 %v263_v9  ;;  %v23_v4 = vld [vmem:[%s1434_s1 + $0x60] sm:$0xff] }
  0x48   :  { %472 = vmatpush.msra.mxu2 %v112_v10  ;;  %430 = vmatpush.msra.mxu0 %v127_v12  ;;  %v151_v5 = vld [vmem:[%s1434_s1 + $0x460] sm:$0xff]  ;;  %v137_v10 = vld [vmem:[%s1434_s1 + $0x3f0] sm:$0xff]  ;;  %v114_v12 = vld [vmem:[%s1434_s1 + $0x338] sm:$0xff] }
  0x49   :  { %492 = vmatpush.msra.mxu3 %v240_v11  ;;  %450 = vmatpush.msra.mxu1 %v255_v13  ;;  %v15_v8 = vld [vmem:[%s1434_s1 + $0x20] sm:$0xff]  ;;  %v265_v11 = vld [vmem:[%s1434_s1 + $0x7f0] sm:$0xff]  ;;  %v242_v13 = vld [vmem:[%s1434_s1 + $0x738] sm:$0xff] }
  0x4a   :  { %473 = vmatpush.msra.mxu2 %v104_v14  ;;  %431 = vmatpush.msra.mxu0 %v119_v16  ;;  %v143_v9 = vld [vmem:[%s1434_s1 + $0x420] sm:$0xff]  ;;  %v129_v14 = vld [vmem:[%s1434_s1 + $0x3b0] sm:$0xff]  ;;  %v106_v16 = vld [vmem:[%s1434_s1 + $0x2f8] sm:$0xff] }
  0x4b   :  { %493 = vmatpush.msra.mxu3 %v232_v15  ;;  %451 = vmatpush.msra.mxu1 %v247_v17  ;;  %v257_v15 = vld [vmem:[%s1434_s1 + $0x7b0] sm:$0xff]  ;;  %v234_v17 = vld [vmem:[%s1434_s1 + $0x6f8] sm:$0xff] }
  0x4c   :  { %474 = vmatpush.msra.mxu2 %v96_v18  ;;  %432 = vmatpush.msra.mxu0 %v111_v20  ;;  %v121_v18 = vld [vmem:[%s1434_s1 + $0x370] sm:$0xff]  ;;  %v98_v20 = vld [vmem:[%s1434_s1 + $0x2b8] sm:$0xff] }
  0x4d   :  { %494 = vmatpush.msra.mxu3 %v224_v19  ;;  %452 = vmatpush.msra.mxu1 %v239_v21  ;;  %v249_v19 = vld [vmem:[%s1434_s1 + $0x770] sm:$0xff]  ;;  %v226_v21 = vld [vmem:[%s1434_s1 + $0x6b8] sm:$0xff] }
  0x4e   :  { %475 = vmatpush.msra.mxu2 %v88_v22  ;;  %433 = vmatpush.msra.mxu0 %v103_v24  ;;  %v113_v22 = vld [vmem:[%s1434_s1 + $0x330] sm:$0xff]  ;;  %v90_v24 = vld [vmem:[%s1434_s1 + $0x278] sm:$0xff] }
  0x4f   :  { %495 = vmatpush.msra.mxu3 %v216_v23  ;;  %453 = vmatpush.msra.mxu1 %v231_v25  ;;  %v241_v23 = vld [vmem:[%s1434_s1 + $0x730] sm:$0xff]  ;;  %v218_v25 = vld [vmem:[%s1434_s1 + $0x678] sm:$0xff] }
  0x50   :  { %476 = vmatpush.msra.mxu2 %v80_v26  ;;  %434 = vmatpush.msra.mxu0 %v95_v28  ;;  %v105_v26 = vld [vmem:[%s1434_s1 + $0x2f0] sm:$0xff]  ;;  %v82_v28 = vld [vmem:[%s1434_s1 + $0x238] sm:$0xff] }
  0x51   :  { %496 = vmatpush.msra.mxu3 %v208_v27  ;;  %454 = vmatpush.msra.mxu1 %v223_v29  ;;  %v233_v27 = vld [vmem:[%s1434_s1 + $0x6f0] sm:$0xff]  ;;  %v210_v29 = vld [vmem:[%s1434_s1 + $0x638] sm:$0xff] }
  0x52   :  { %477 = vmatpush.msra.mxu2 %v72_v30  ;;  %435 = vmatpush.msra.mxu0 %v87_v32  ;;  %v97_v30 = vld [vmem:[%s1434_s1 + $0x2b0] sm:$0xff]  ;;  %v74_v32 = vld [vmem:[%s1434_s1 + $0x1f8] sm:$0xff] }
  0x53   :  { %497 = vmatpush.msra.mxu3 %v200_v31  ;;  %455 = vmatpush.msra.mxu1 %v215_v33  ;;  %v225_v31 = vld [vmem:[%s1434_s1 + $0x6b0] sm:$0xff]  ;;  %v202_v33 = vld [vmem:[%s1434_s1 + $0x5f8] sm:$0xff] }
  0x54   :  { %478 = vmatpush.msra.mxu2 %v64_v34  ;;  %436 = vmatpush.msra.mxu0 %v79_v36  ;;  %v89_v34 = vld [vmem:[%s1434_s1 + $0x270] sm:$0xff]  ;;  %v66_v36 = vld [vmem:[%s1434_s1 + $0x1b8] sm:$0xff] }
  0x55   :  { %498 = vmatpush.msra.mxu3 %v192_v35  ;;  %456 = vmatpush.msra.mxu1 %v207_v37  ;;  %v217_v35 = vld [vmem:[%s1434_s1 + $0x670] sm:$0xff]  ;;  %v194_v37 = vld [vmem:[%s1434_s1 + $0x5b8] sm:$0xff] }
  0x56   :  { %479 = vmatpush.msra.mxu2 %v56_v38  ;;  %437 = vmatpush.msra.mxu0 %v71_v40  ;;  %v81_v38 = vld [vmem:[%s1434_s1 + $0x230] sm:$0xff]  ;;  %v58_v40 = vld [vmem:[%s1434_s1 + $0x178] sm:$0xff] }
  0x57   :  { %499 = vmatpush.msra.mxu3 %v184_v39  ;;  %457 = vmatpush.msra.mxu1 %v199_v41  ;;  %v209_v39 = vld [vmem:[%s1434_s1 + $0x630] sm:$0xff]  ;;  %v186_v41 = vld [vmem:[%s1434_s1 + $0x578] sm:$0xff] }
  0x58   :  { %480 = vmatpush.msra.mxu2 %v48_v42  ;;  %438 = vmatpush.msra.mxu0 %v63_v44  ;;  %v73_v42 = vld [vmem:[%s1434_s1 + $0x1f0] sm:$0xff]  ;;  %v50_v44 = vld [vmem:[%s1434_s1 + $0x138] sm:$0xff] }
  0x59   :  { %500 = vmatpush.msra.mxu3 %v176_v43  ;;  %458 = vmatpush.msra.mxu1 %v191_v45  ;;  %v201_v43 = vld [vmem:[%s1434_s1 + $0x5f0] sm:$0xff]  ;;  %v178_v45 = vld [vmem:[%s1434_s1 + $0x538] sm:$0xff] }
  0x5a   :  { %481 = vmatpush.msra.mxu2 %v40_v46  ;;  %439 = vmatpush.msra.mxu0 %v55_v48  ;;  %v65_v46 = vld [vmem:[%s1434_s1 + $0x1b0] sm:$0xff]  ;;  %v42_v48 = vld [vmem:[%s1434_s1 + $0xf8] sm:$0xff] }
  0x5b   :  { %501 = vmatpush.msra.mxu3 %v168_v47  ;;  %459 = vmatpush.msra.mxu1 %v183_v49  ;;  %v193_v47 = vld [vmem:[%s1434_s1 + $0x5b0] sm:$0xff]  ;;  %v170_v49 = vld [vmem:[%s1434_s1 + $0x4f8] sm:$0xff] }
  0x5c   :  { %482 = vmatpush.msra.mxu2 %v32_v50  ;;  %440 = vmatpush.msra.mxu0 %v47_v52  ;;  %v57_v50 = vld [vmem:[%s1434_s1 + $0x170] sm:$0xff]  ;;  %v34_v52 = vld [vmem:[%s1434_s1 + $0xb8] sm:$0xff] }
  0x5d   :  { %502 = vmatpush.msra.mxu3 %v160_v51  ;;  %460 = vmatpush.msra.mxu1 %v175_v53  ;;  %v185_v51 = vld [vmem:[%s1434_s1 + $0x570] sm:$0xff]  ;;  %v162_v53 = vld [vmem:[%s1434_s1 + $0x4b8] sm:$0xff] }
  0x5e   :  { %483 = vmatpush.msra.mxu2 %v24_v54  ;;  %441 = vmatpush.msra.mxu0 %v39_v56  ;;  %v49_v54 = vld [vmem:[%s1434_s1 + $0x130] sm:$0xff]  ;;  %v26_v56 = vld [vmem:[%s1434_s1 + $0x78] sm:$0xff] }
  0x5f   :  { %503 = vmatpush.msra.mxu3 %v152_v55  ;;  %461 = vmatpush.msra.mxu1 %v167_v57  ;;  %v177_v55 = vld [vmem:[%s1434_s1 + $0x530] sm:$0xff]  ;;  %v154_v57 = vld [vmem:[%s1434_s1 + $0x478] sm:$0xff] }
  0x60   :  { %484 = vmatpush.msra.mxu2 %v16_v60  ;;  %425 = vmatmul.f32.vlgmr.msrb.gmra.mxu3 %v990_v59  ;;  %v41_v60 = vld [vmem:[%s1434_s1 + $0xf0] sm:$0xff] }
  0x61   :  { %504 = vmatpush.msra.mxu3 %v144_v61  ;;  %405 = vmatmul.f32.vlgmr.msrb.gmra.mxu2 %v985_v58  ;;  %v169_v61 = vld [vmem:[%s1434_s1 + $0x4f0] sm:$0xff] }
  0x62   :  { %549 = vmatpush.msrb.mxu2 %v138_v62  ;;  %442 = vmatpush.msra.mxu0 %v31_v0  ;;  %v18_v62 = vld [vmem:[%s1434_s1 + $0x38] sm:$0xff]  ;;  %v33_v0 = vld [vmem:[%s1434_s1 + $0xb0] sm:$0xff] }
  0x63   :  { %569 = vmatpush.msrb.mxu3 %v266_v63  ;;  %462 = vmatpush.msra.mxu1 %v159_v1  ;;  %v146_v63 = vld [vmem:[%s1434_s1 + $0x438] sm:$0xff]  ;;  %v161_v1 = vld [vmem:[%s1434_s1 + $0x4b0] sm:$0xff] }
  0x64   :  { %550 = vmatpush.msrb.mxu2 %v130_v2  ;;  %443 = vmatpush.msra.mxu0 %v23_v4  ;;  %v25_v2 = vld [vmem:[%s1434_s1 + $0x70] sm:$0xff] }
  0x65   :  { %570 = vmatpush.msrb.mxu3 %v258_v3  ;;  %463 = vmatpush.msra.mxu1 %v151_v5  ;;  %v153_v3 = vld [vmem:[%s1434_s1 + $0x470] sm:$0xff] }
  0x66   :  { %551 = vmatpush.msrb.mxu2 %v122_v6  ;;  %444 = vmatpush.msra.mxu0 %v15_v8  ;;  %v17_v4 = vld [vmem:[%s1434_s1 + $0x30] sm:$0xff] }
  0x67   :  { %571 = vmatpush.msrb.mxu3 %v250_v7  ;;  %464 = vmatpush.msra.mxu1 %v143_v9  ;;  %v145_v5 = vld [vmem:[%s1434_s1 + $0x430] sm:$0xff] }
  0x68   :  { %365 = vmatmul.f32.vlgmr.msrb.gmra.mxu0 %v985_v58  ;;  %385 = vmatmul.f32.vlgmr.msrb.gmra.mxu1 %v990_v59 }
  0x69   :  { %509 = vmatpush.msrb.mxu0 %v137_v10  ;;  %529 = vmatpush.msrb.mxu1 %v265_v11 }
  0x6a   :  { %552 = vmatpush.msrb.mxu2 %v114_v12  ;;  %572 = vmatpush.msrb.mxu3 %v242_v13 }
  0x6b   :  { %510 = vmatpush.msrb.mxu0 %v129_v14  ;;  %530 = vmatpush.msrb.mxu1 %v257_v15 }
  0x6c   :  { %553 = vmatpush.msrb.mxu2 %v106_v16  ;;  %573 = vmatpush.msrb.mxu3 %v234_v17 }
  0x6d   :  { %511 = vmatpush.msrb.mxu0 %v121_v18  ;;  %531 = vmatpush.msrb.mxu1 %v249_v19 }
  0x6e   :  { %554 = vmatpush.msrb.mxu2 %v98_v20  ;;  %574 = vmatpush.msrb.mxu3 %v226_v21 }
  0x6f   :  { %512 = vmatpush.msrb.mxu0 %v113_v22  ;;  %532 = vmatpush.msrb.mxu1 %v241_v23 }
  0x70   :  { %555 = vmatpush.msrb.mxu2 %v90_v24  ;;  %575 = vmatpush.msrb.mxu3 %v218_v25 }
  0x71   :  { %513 = vmatpush.msrb.mxu0 %v105_v26  ;;  %533 = vmatpush.msrb.mxu1 %v233_v27 }
  0x72   :  { %556 = vmatpush.msrb.mxu2 %v82_v28  ;;  %576 = vmatpush.msrb.mxu3 %v210_v29 }
  0x73   :  { %514 = vmatpush.msrb.mxu0 %v97_v30  ;;  %534 = vmatpush.msrb.mxu1 %v225_v31 }
  0x74   :  { %557 = vmatpush.msrb.mxu2 %v74_v32  ;;  %577 = vmatpush.msrb.mxu3 %v202_v33 }
  0x75   :  { %515 = vmatpush.msrb.mxu0 %v89_v34  ;;  %535 = vmatpush.msrb.mxu1 %v217_v35 }
  0x76   :  { %558 = vmatpush.msrb.mxu2 %v66_v36  ;;  %578 = vmatpush.msrb.mxu3 %v194_v37 }
  0x77   :  { %516 = vmatpush.msrb.mxu0 %v81_v38  ;;  %536 = vmatpush.msrb.mxu1 %v209_v39 }
  0x78   :  { %559 = vmatpush.msrb.mxu2 %v58_v40  ;;  %579 = vmatpush.msrb.mxu3 %v186_v41 }
  0x79   :  { %517 = vmatpush.msrb.mxu0 %v73_v42  ;;  %537 = vmatpush.msrb.mxu1 %v201_v43 }
  0x7a   :  { %560 = vmatpush.msrb.mxu2 %v50_v44  ;;  %580 = vmatpush.msrb.mxu3 %v178_v45 }
  0x7b   :  { %485 = vmatmul.f32.vlgmr.msra.gmra.mxu2 %v985_v58  ;;  %505 = vmatmul.f32.vlgmr.msra.gmra.mxu3 %v990_v59 }
  0x7c   :  { %518 = vmatpush.msrb.mxu0 %v65_v46  ;;  %538 = vmatpush.msrb.mxu1 %v193_v47 }
  0x7d   :  { %561 = vmatpush.msrb.mxu2 %v42_v48  ;;  %581 = vmatpush.msrb.mxu3 %v170_v49 }
  0x7e   :  { %519 = vmatpush.msrb.mxu0 %v57_v50  ;;  %539 = vmatpush.msrb.mxu1 %v185_v51 }
  0x7f   :  { %562 = vmatpush.msrb.mxu2 %v34_v52  ;;  %582 = vmatpush.msrb.mxu3 %v162_v53 }
  0x80   :  { %520 = vmatpush.msrb.mxu0 %v49_v54  ;;  %540 = vmatpush.msrb.mxu1 %v177_v55 }
  0x81   :  { %563 = vmatpush.msrb.mxu2 %v26_v56  ;;  %583 = vmatpush.msrb.mxu3 %v154_v57 }
  0x82   :  { %445 = vmatmul.f32.vlgmr.msra.gmra.mxu0 %v985_v58  ;;  %465 = vmatmul.f32.vlgmr.msra.gmra.mxu1 %v990_v59 }
  0x83   :  { %521 = vmatpush.msrb.mxu0 %v41_v60  ;;  %541 = vmatpush.msrb.mxu1 %v169_v61 }
  0x84   :  { %564 = vmatpush.msrb.mxu2 %v18_v62  ;;  %584 = vmatpush.msrb.mxu3 %v146_v63 }
  0x85   :  { %565 = vmatmul.f32.vlgmr.msrb.gmra.mxu2 %v985_v58  ;;  %585 = vmatmul.f32.vlgmr.msrb.gmra.mxu3 %v990_v59 }
  0x86   :  { %522 = vmatpush.msrb.mxu0 %v33_v0  ;;  %542 = vmatpush.msrb.mxu1 %v161_v1 }
  0x88   :  { %523 = vmatpush.msrb.mxu0 %v25_v2  ;;  %543 = vmatpush.msrb.mxu1 %v153_v3 }
  0x8a   :  { %524 = vmatpush.msrb.mxu0 %v17_v4  ;;  %544 = vmatpush.msrb.mxu1 %v145_v5 }
  0x8b   :  { %525 = vmatmul.f32.vlgmr.msrb.gmra.mxu0 %v985_v58  ;;  %545 = vmatmul.f32.vlgmr.msrb.gmra.mxu1 %v990_v59 }
  0xbf   :  { %v346_v7 = vpop.f32.mrf.mxu3 }
  0xc0   :  { %v326_v6 = vpop.f32.mrf.mxu2 }
  0xc1   :  { %v286_v8 = vpop.f32.mrf.mxu0  ;;  %v347_v10 = vadd.f32 %v346_v7, %v326_v6 }
  0xc2   :  { %v306_v9 = vpop.f32.mrf.mxu1 }
  0xc3   :  { %v307_v11 = vadd.f32 %v306_v9, %v286_v8  ;;  %590 = vst [vmem:[%s1436_s2 + $0x8] sm:$0xff] %v347_v10 }
  0xc5   :  { %589 = vst [vmem:[%s1436_s2] sm:$0xff] %v307_v11 }
  0xe3   :  { %v426_v13 = vpop.f32.mrf.mxu3 }
  0xe4   :  { %v406_v12 = vpop.f32.mrf.mxu2 }
  0xe5   :  { %v366_v14 = vpop.f32.mrf.mxu0  ;;  %v386_v58 = vpop.f32.mrf.mxu1  ;;  %v427_v15 = vadd.f32 %v426_v13, %v406_v12 }
  0xe6   :  { %v387_v59 = vadd.f32 %v386_v58, %v366_v14 }
  0xe7   :  { %592 = vst [vmem:[%s1436_s2 + $0x18] sm:$0xff] %v427_v15 }
  0xe8   :  { %591 = vst [vmem:[%s1436_s2 + $0x10] sm:$0xff] %v387_v59 }
  0xfe   :  { %v486_v16 = vpop.f32.mrf.mxu2  ;;  %v506_v17 = vpop.f32.mrf.mxu3 }
  0xff   :  { %v446_v18 = vpop.f32.mrf.mxu0  ;;  %v466_v19 = vpop.f32.mrf.mxu1  ;;  %v507_v20 = vadd.f32 %v506_v17, %v486_v16 }
 0x100   :  { %v467_v21 = vadd.f32 %v466_v19, %v446_v18 }
 0x101   :  { %594 = vst [vmem:[%s1436_s2 + $0x28] sm:$0xff] %v507_v20 }
 0x102   :  { %593 = vst [vmem:[%s1436_s2 + $0x20] sm:$0xff] %v467_v21 }
 0x108   :  { %v526_v22 = vpop.f32.mrf.mxu0  ;;  %v546_v23 = vpop.f32.mrf.mxu1 }
 0x109   :  { %v547_v24 = vadd.f32 %v546_v23, %v526_v22  ;;  %v566_v25 = vpop.f32.mrf.mxu2  ;;  %v586_v26 = vpop.f32.mrf.mxu3 }
 0x10a   :  { %v587_v27 = vadd.f32 %v586_v26, %v566_v25 }
 0x10b   :  { %595 = vst [vmem:[%s1436_s2 + $0x30] sm:$0xff] %v547_v24 }
 0x10c   :  { %596 = vst [vmem:[%s1436_s2 + $0x38] sm:$0xff] %v587_v27 }

</bundles_post_ra>
